<compile_context>
chip_gen: v5e
topology: v5e:2x2
jax: 0.10.0
libtpu: 0.0.40
codegen_flags: <defaults>
</compile_context>

<pallas_src>
import functools

import jax
import jax.numpy as jnp
from jax.experimental import pallas as pl
from jax.experimental.pallas import tpu as pltpu

IN_FEATURES = 28 * 28    # 784
OUT_FEATURES = 10        # nn.Linear out_features
WEIGHT_PAD = 128         # lane-dense padded weight width -> one clean MXU tile


def _linear_kernel(x_ref, wt_ref, b_ref, o_ref, *, mxu_bf16):
    # x_ref:  (TB, 784)   VMEM  streamed activation tile
    # wt_ref: (784, 128)  VMEM  resident, pre-transposed, lane-padded weight
    # b_ref:  (1, 10)     VMEM  resident bias
    # o_ref:  (TB, 10)    VMEM  output tile (masked store on ragged last block)
    x = x_ref[...]
    w = wt_ref[...]
    if mxu_bf16:
        # Explicit choice for v5e: single-pass bf16 multiply, f32 accumulate,
        # keeps the MXU time under the HBM stream time.
        x = x.astype(jnp.bfloat16)
        w = w.astype(jnp.bfloat16)
    else:
        # Explicit choice for v6e/v7x: f32 operands on the MXU (extra passes
        # hide under the DMA of the x stream on these generations).
        x = x.astype(jnp.float32)
    acc = jnp.dot(x, w, preferred_element_type=jnp.float32)      # (TB, 128) f32
    o_ref[...] = acc[:, :OUT_FEATURES] + b_ref[...]              # (TB, 10)


def prepare_params(weight, bias):
    """One-time parameter prep (hoisted out of forward).

    weight: (10, 784) -> wt_pad (784, 128) f32  (transposed + lane-padded)
    bias:   (10,)     -> bias2d (1, 10)    f32
    """
    wt = weight.astype(jnp.float32).T                                   # (784, 10)
    wt_pad = jnp.zeros((IN_FEATURES, WEIGHT_PAD), jnp.float32)
    wt_pad = wt_pad.at[:, :OUT_FEATURES].set(wt)
    bias2d = bias.astype(jnp.float32).reshape(1, OUT_FEATURES)
    return wt_pad, bias2d


@functools.lru_cache(maxsize=1)
def _chip_config():
    """Per-generation tile size / precision / core-parallelism defaults."""
    try:
        kind = jax.devices()[0].device_kind.lower()
    except Exception:  # pragma: no cover - defensive
        kind = ""
    if "v7" in kind:
        # 2 TCs, 3.2 TB/s HBM: bigger tiles + actually shard the batch grid
        # across both cores; set the scoped-VMEM limit explicitly (<64 MiB/TC).
        return dict(tile_rows=4096, mxu_bf16=False,
                    dim_sem="core_parallel", vmem_limit_bytes=48 * 1024 * 1024)
    if "v6" in kind:
        # 2048-row tile (~16 MB double-buffered) fits the 32 MiB scoped default.
        return dict(tile_rows=2048, mxu_bf16=False,
                    dim_sem="parallel", vmem_limit_bytes=None)
    if "v5" in kind and ("lite" in kind or "v5e" in kind):
        # 16 MiB scoped default: keep TB=1024; bf16 MXU path keeps it mem-bound.
        return dict(tile_rows=1024, mxu_bf16=True,
                    dim_sem="parallel", vmem_limit_bytes=None)
    # Conservative fallback for any other / unknown TPU.
    return dict(tile_rows=1024, mxu_bf16=False,
                dim_sem="parallel", vmem_limit_bytes=None)


@functools.partial(
    jax.jit,
    static_argnames=("tile_rows", "mxu_bf16", "dim_sem", "vmem_limit_bytes"))
def _forward_impl(x_flat, wt_pad, bias2d, *, tile_rows, mxu_bf16, dim_sem,
                  vmem_limit_bytes):
    b = x_flat.shape[0]
    tb = min(tile_rows, b)          # single full-extent block for small batches
    grid = (pl.cdiv(b, tb),)        # ragged last block handled by Pallas

    if dim_sem == "core_parallel":
        semantics = (pltpu.CORE_PARALLEL,)
    else:
        semantics = ("parallel",)

    cost = pl.CostEstimate(
        flops=2 * b * IN_FEATURES * WEIGHT_PAD,
        transcendentals=0,
        bytes_accessed=(b * IN_FEATURES * x_flat.dtype.itemsize   # x stream
                        + IN_FEATURES * WEIGHT_PAD * 4            # resident W
                        + OUT_FEATURES * 4                        # bias
                        + b * OUT_FEATURES * 4),                  # narrow output
    )

    kernel = functools.partial(_linear_kernel, mxu_bf16=mxu_bf16)

    return pl.pallas_call(
        kernel,
        out_shape=jax.ShapeDtypeStruct((b, OUT_FEATURES), jnp.float32),
        grid=grid,
        in_specs=[
            pl.BlockSpec((tb, IN_FEATURES), lambda i: (i, 0)),          # streamed
            pl.BlockSpec((IN_FEATURES, WEIGHT_PAD), lambda i: (0, 0)),  # resident
            pl.BlockSpec((1, OUT_FEATURES), lambda i: (0, 0)),          # resident
        ],
        out_specs=pl.BlockSpec((tb, OUT_FEATURES), lambda i: (i, 0)),
        compiler_params=pltpu.CompilerParams(
            dimension_semantics=semantics,
            vmem_limit_bytes=vmem_limit_bytes,
        ),
        cost_estimate=cost,
    )(x_flat, wt_pad, bias2d)


def simple_model_forward(x, wt_pad, bias2d, *, tile_rows=None, mxu_bf16=None):
    """Forward pass matching SimplePyTorchModel.

    x:      (B, 1, 28, 28) or (B, 784), any float dtype (fed to the kernel as-is)
    wt_pad: (784, 128) from prepare_params
    bias2d: (1, 10)    from prepare_params
    returns (B, 10) float32
    """
    cfg = _chip_config()
    if tile_rows is None:
        tile_rows = cfg["tile_rows"]
    if mxu_bf16 is None:
        mxu_bf16 = cfg["mxu_bf16"]
    # No forced astype here: the x stream is ~86% of HBM traffic; if the
    # producer already emits bf16, it is streamed as bf16 and cast in-kernel.
    x_flat = x.reshape(-1, IN_FEATURES)
    return _forward_impl(
        x_flat, wt_pad, bias2d,
        tile_rows=int(tile_rows), mxu_bf16=bool(mxu_bf16),
        dim_sem=cfg["dim_sem"], vmem_limit_bytes=cfg["vmem_limit_bytes"])


def init_params(key):
    """Deterministic init matching nn.Linear's default (uniform +-1/sqrt(fan_in))."""
    kw, kb = jax.random.split(key)
    bound = 1.0 / jnp.sqrt(jnp.float32(IN_FEATURES))
    weight = jax.random.uniform(
        kw, (OUT_FEATURES, IN_FEATURES), jnp.float32, -bound, bound)
    bias = jax.random.uniform(kb, (OUT_FEATURES,), jnp.float32, -bound, bound)
    return weight, bias


if __name__ == "__main__":
    key = jax.random.PRNGKey(0)
    k_x, k_p = jax.random.split(key)

    weight, bias = init_params(k_p)
    wt_pad, bias2d = prepare_params(weight, bias)

    cfg = _chip_config()
    # bf16-MXU path (v5e) has ~1e-3-level error vs. an f32 XLA reference.
    tol = 5e-2 if cfg["mxu_bf16"] else 2e-4

    # Small batch, NCHW like the PyTorch module.
    batch = 4
    x = jax.random.normal(k_x, (batch, 1, 28, 28), jnp.float32)
    y = simple_model_forward(x, wt_pad, bias2d)
    jax.block_until_ready(y)
    y_ref = x.reshape(-1, IN_FEATURES) @ weight.T + bias
    assert y.shape == (batch, OUT_FEATURES)
    assert jnp.allclose(y, y_ref, atol=tol, rtol=tol)

    # Multi-tile, non-divisible batch: exercises the no-pad ragged-grid path
    # (grid = cdiv(260, 128) = 3; tail block has 4 valid rows, masked store).
    big_b = 260
    xb = jax.random.normal(k_x, (big_b, 1, 28, 28), jnp.float32)
    yb = simple_model_forward(xb, wt_pad, bias2d, tile_rows=128)
    jax.block_until_ready(yb)
    yb_ref = xb.reshape(-1, IN_FEATURES) @ weight.T + bias
    assert yb.shape == (big_b, OUT_FEATURES)
    assert jnp.allclose(yb, yb_ref, atol=tol, rtol=tol)

    print("KERNEL_OK")
</pallas_src>

<mosaic_0001>
module attributes {stable_mosaic.version = 11 : i64} {
  func.func @_linear_kernel(%arg0: i32, %arg1: memref<4x784xf32, #tpu.memory_space<vmem>>, %arg2: memref<784x128xf32, #tpu.memory_space<vmem>>, %arg3: memref<1x10xf32, #tpu.memory_space<vmem>>, %arg4: memref<4x10xf32, #tpu.memory_space<vmem>>) attributes {dimension_semantics = [#tpu.dimension_semantics<parallel>], iteration_bounds = array<i64: 1>, scalar_prefetch = 0 : i64, scratch_operands = 0 : i64, tpu.core_type = #tpu.core_type<tc>, window_params = [{transform_indices = @transform_0, window_bounds = array<i64: 4, 784>}, {pipeline_mode = #tpu.pipeline_mode<synchronous>, transform_indices = @transform_1, window_bounds = array<i64: 784, 128>}, {pipeline_mode = #tpu.pipeline_mode<synchronous>, transform_indices = @transform_2, window_bounds = array<i64: 1, 10>}, {transform_indices = @transform_3, window_bounds = array<i64: 4, 10>}]} {
    %c0 = arith.constant 0 : index
    %c0_0 = arith.constant 0 : index
    %0 = vector.load %arg1[%c0, %c0_0] : memref<4x784xf32, #tpu.memory_space<vmem>>, vector<4x784xf32>
    %c0_1 = arith.constant 0 : index
    %c0_2 = arith.constant 0 : index
    %1 = vector.load %arg2[%c0_1, %c0_2] : memref<784x128xf32, #tpu.memory_space<vmem>>, vector<784x128xf32>
    %cst = arith.constant dense<0.000000e+00> : vector<4x128xf32>
    %2 = tpu.matmul %0, %1, %cst {dimension_numbers = #tpu.dot_dimension_numbers<[1], [0], [0], [1], [0, 0, 1, 1], [], []>} : vector<4x784xf32>, vector<784x128xf32>, vector<4x128xf32> -> vector<4x128xf32>
    %3 = vector.extract_strided_slice %2 {offsets = [0, 0], sizes = [4, 10], strides = [1, 1]} : vector<4x128xf32> to vector<4x10xf32>
    %c0_3 = arith.constant 0 : index
    %c0_4 = arith.constant 0 : index
    %4 = vector.load %arg3[%c0_3, %c0_4] : memref<1x10xf32, #tpu.memory_space<vmem>>, vector<1x10xf32>
    %5 = vector.broadcast %4 : vector<1x10xf32> to vector<4x10xf32>
    %6 = arith.addf %3, %5 : vector<4x10xf32>
    %c0_5 = arith.constant 0 : index
    %c0_6 = arith.constant 0 : index
    %7 = vector.load %arg4[%c0_5, %c0_6] : memref<4x10xf32, #tpu.memory_space<vmem>>, vector<4x10xf32>
    tpu.vector_store %arg4[%c0_5, %c0_6], %6 {strides = array<i32>} : memref<4x10xf32, #tpu.memory_space<vmem>>, vector<4x10xf32>,
    return
  }
  func.func @transform_0(%arg0: i32) -> (i32, i32) {
    %c0_i32 = arith.constant 0 : i32
    %c0_i32_0 = arith.constant 0 : i32
    return %arg0, %c0_i32 : i32, i32
  }
  func.func @transform_1(%arg0: i32) -> (i32, i32) {
    %c0_i32 = arith.constant 0 : i32
    %c0_i32_0 = arith.constant 0 : i32
    %c0_i32_1 = arith.constant 0 : i32
    return %c0_i32, %c0_i32_0 : i32, i32
  }
  func.func @transform_2(%arg0: i32) -> (i32, i32) {
    %c0_i32 = arith.constant 0 : i32
    %c0_i32_0 = arith.constant 0 : i32
    %c0_i32_1 = arith.constant 0 : i32
    return %c0_i32, %c0_i32_0 : i32, i32
  }
  func.func @transform_3(%arg0: i32) -> (i32, i32) {
    %c0_i32 = arith.constant 0 : i32
    %c0_i32_0 = arith.constant 0 : i32
    return %arg0, %c0_i32 : i32, i32
  }
}

</mosaic_0001>

<bundles_post_ra>
// kernel: _forward_impl.1
= control target key start
LH: loop header
LB: loop body
LE: loop exit
PB: predicated region body
PF: predicated region fallthrough
CT: control target
= control target key end

     0   :  { %8 = vsyncpa [#allocation3], 0  ;;  %s461_s0 = inlined_call_operand.hbm [shape: f32[4,784], index: 0, kind: input, shape index: {}]   ;;  %s462_s1 = inlined_call_operand.hbm [shape: f32[784,128], index: 1, kind: input, shape index: {}]   ;;  %s463_s2 = inlined_call_operand.vmem [shape: f32[1,10], index: 2, kind: input, shape index: {}]   ;;  %s464_s3 = inlined_call_operand.hbm [shape: f32[4,10], index: 3, kind: output, shape index: {}]  }
   0x1   :  { %9 = vsyncpa [#allocation6], 0 }
   0x2   :  { %10 = vsyncpa [#allocation4], 0  ;;  %s16_s14 = sshll.u32 %s461_s0, 4  ;;  %s424_s15 = smov [#allocation2]   ;;  %s17_s14 = int_to_ptr.hbm [resolvable:$true] %s16_s14 }
   0x3   :  { %s18_s16 = sshll.u32 %s424_s15, 4  ;;  %s26_s19 = sshll.u32 %s462_s1, 4  ;;  %s19_s16 = int_to_ptr.vmem [resolvable:$true] %s18_s16  ;;  %s27_s19 = int_to_ptr.hbm [resolvable:$true] %s26_s19 }
   0x4   :  { %21 = dma.hbm_to_vmem [thread:$0]  %s17_s14, 448, %s19_s16, [#allocation3]  }
   0x5   :  { %s425_s20 = smov [#allocation5]   ;;  %s426_s22 = smov 128  }
   0x6   :  { %s28_s21 = sshll.u32 %s425_s20, 4  ;;  %s427_s23 = smov 8   ;;  %s29_s21 = int_to_ptr.vmem [resolvable:$true] %s28_s21 }
   0x7   :  { %34 = dma.hbm_to_vmem [thread:$0]  %s27_s19, 12544, %s29_s21, [#allocation6], %s426_s22, %s426_s22, %s427_s23  }
   0x8   :  { %418 = dma.done.wait [#allocation3], 448  }
   0x9   :  { %419 = vsyncadd [#allocation3], 4294966848 }
   0xa   :  { %420 = dma.done.wait [#allocation6], 12544  }
   0xb   :  { %421 = vsyncadd [#allocation6], 4294954752  ;;  %v64_v0 = vld [vmem:[#allocation5 + $0x78] sm:$0xff]  ;;  %v63_v1 = vld [vmem:[#allocation5 + $0x70] sm:$0xff]  ;;  %vm171_vm0 = vcmask 130048   ;;  %s428_s24 = smov [#allocation7]  }
   0xc   :  { %v80_v2 = vld [vmem:[#allocation5 + $0xf8] sm:$0xff]  ;;  %174 = vmatpush.msra.mxu0 %v64_v0  ;;  %v79_v3 = vld [vmem:[#allocation5 + $0xf0] sm:$0xff]  ;;  %v62_v4 = vld [vmem:[#allocation5 + $0x68] sm:$0xff]  ;;  %s326_s25 = sshll.u32 %s428_s24, 4  ;;  %s328_s28 = sshll.u32 %s464_s3, 4  ;;  %vm319_vm1 = vcmask 76800   ;;  %s327_s25 = int_to_ptr.vmem [resolvable:$true] %s326_s25  ;;  %s329_s28 = int_to_ptr.hbm [resolvable:$true] %s328_s28 }
   0xd   :  { %194 = vmatpush.msra.mxu1 %v80_v2  ;;  %v78_v5 = vld [vmem:[#allocation5 + $0xe8] sm:$0xff]  ;;  %v61_v6 = vld [vmem:[#allocation5 + $0x60] sm:$0xff]  ;;  %v60_v8 = vld [vmem:[#allocation5 + $0x58] sm:$0xff] }
   0xe   :  { %175 = vmatpush.msra.mxu0 %v63_v1  ;;  %v77_v7 = vld [vmem:[#allocation5 + $0xe0] sm:$0xff]  ;;  %v76_v9 = vld [vmem:[#allocation5 + $0xd8] sm:$0xff]  ;;  %v95_v11 = vld [vmem:[#allocation5 + $0x170] sm:$0xff] }
   0xf   :  { %195 = vmatpush.msra.mxu1 %v79_v3  ;;  %v96_v10 = vld [vmem:[#allocation5 + $0x178] sm:$0xff]  ;;  %v59_v13 = vld [vmem:[#allocation5 + $0x50] sm:$0xff]  ;;  %v94_v15 = vld [vmem:[#allocation5 + $0x168] sm:$0xff] }
  0x10   :  { %176 = vmatpush.msra.mxu0 %v62_v4  ;;  %v112_v12 = vld [vmem:[#allocation5 + $0x1f8] sm:$0xff]  ;;  %v75_v14 = vld [vmem:[#allocation5 + $0xd0] sm:$0xff]  ;;  %214 = vmatpush.msra.mxu2 %v96_v10  ;;  %v58_v17 = vld [vmem:[#allocation5 + $0x48] sm:$0xff] }
  0x11   :  { %196 = vmatpush.msra.mxu1 %v78_v5  ;;  %234 = vmatpush.msra.mxu3 %v112_v12  ;;  %v111_v16 = vld [vmem:[#allocation5 + $0x1f0] sm:$0xff]  ;;  %v74_v18 = vld [vmem:[#allocation5 + $0xc8] sm:$0xff]  ;;  %v93_v20 = vld [vmem:[#allocation5 + $0x160] sm:$0xff] }
  0x12   :  { %177 = vmatpush.msra.mxu0 %v61_v6  ;;  %215 = vmatpush.msra.mxu2 %v95_v11  ;;  %v110_v19 = vld [vmem:[#allocation5 + $0x1e8] sm:$0xff]  ;;  %v109_v21 = vld [vmem:[#allocation5 + $0x1e0] sm:$0xff]  ;;  %v92_v24 = vld [vmem:[#allocation5 + $0x158] sm:$0xff] }
  0x13   :  { %197 = vmatpush.msra.mxu1 %v77_v7  ;;  %235 = vmatpush.msra.mxu3 %v111_v16  ;;  %v57_v22 = vld [vmem:[#allocation5 + $0x40] sm:$0xff]  ;;  %v108_v25 = vld [vmem:[#allocation5 + $0x1d8] sm:$0xff]  ;;  %v91_v28 = vld [vmem:[#allocation5 + $0x150] sm:$0xff] }
  0x14   :  { %178 = vmatpush.msra.mxu0 %v60_v8  ;;  %v73_v23 = vld [vmem:[#allocation5 + $0xc0] sm:$0xff]  ;;  %216 = vmatpush.msra.mxu2 %v94_v15  ;;  %v56_v26 = vld [vmem:[#allocation5 + $0x38] sm:$0xff]  ;;  %v107_v29 = vld [vmem:[#allocation5 + $0x1d0] sm:$0xff] }
  0x15   :  { %198 = vmatpush.msra.mxu1 %v76_v9  ;;  %236 = vmatpush.msra.mxu3 %v110_v19  ;;  %v72_v27 = vld [vmem:[#allocation5 + $0xb8] sm:$0xff]  ;;  %v55_v30 = vld [vmem:[#allocation5 + $0x30] sm:$0xff]  ;;  %v90_v32 = vld [vmem:[#allocation5 + $0x148] sm:$0xff] }
  0x16   :  { %179 = vmatpush.msra.mxu0 %v59_v13  ;;  %217 = vmatpush.msra.mxu2 %v93_v20  ;;  %v71_v31 = vld [vmem:[#allocation5 + $0xb0] sm:$0xff]  ;;  %v106_v33 = vld [vmem:[#allocation5 + $0x1c8] sm:$0xff]  ;;  %v89_v36 = vld [vmem:[#allocation5 + $0x140] sm:$0xff] }
  0x17   :  { %199 = vmatpush.msra.mxu1 %v75_v14  ;;  %237 = vmatpush.msra.mxu3 %v109_v21  ;;  %v54_v34 = vld [vmem:[#allocation5 + $0x28] sm:$0xff]  ;;  %v105_v37 = vld [vmem:[#allocation5 + $0x1c0] sm:$0xff]  ;;  %v88_v40 = vld [vmem:[#allocation5 + $0x138] sm:$0xff] }
  0x18   :  { %180 = vmatpush.msra.mxu0 %v58_v17  ;;  %218 = vmatpush.msra.mxu2 %v92_v24  ;;  %v70_v35 = vld [vmem:[#allocation5 + $0xa8] sm:$0xff]  ;;  %v53_v38 = vld [vmem:[#allocation5 + $0x20] sm:$0xff]  ;;  %v104_v41 = vld [vmem:[#allocation5 + $0x1b8] sm:$0xff] }
  0x19   :  { %200 = vmatpush.msra.mxu1 %v74_v18  ;;  %238 = vmatpush.msra.mxu3 %v108_v25  ;;  %v69_v39 = vld [vmem:[#allocation5 + $0xa0] sm:$0xff]  ;;  %v52_v42 = vld [vmem:[#allocation5 + $0x18] sm:$0xff]  ;;  %v87_v44 = vld [vmem:[#allocation5 + $0x130] sm:$0xff] }
  0x1a   :  { %181 = vmatpush.msra.mxu0 %v57_v22  ;;  %219 = vmatpush.msra.mxu2 %v91_v28  ;;  %v68_v43 = vld [vmem:[#allocation5 + $0x98] sm:$0xff]  ;;  %v103_v45 = vld [vmem:[#allocation5 + $0x1b0] sm:$0xff]  ;;  %v86_v48 = vld [vmem:[#allocation5 + $0x128] sm:$0xff] }
  0x1b   :  { %201 = vmatpush.msra.mxu1 %v73_v23  ;;  %239 = vmatpush.msra.mxu3 %v107_v29  ;;  %v51_v46 = vld [vmem:[#allocation5 + $0x10] sm:$0xff]  ;;  %v102_v49 = vld [vmem:[#allocation5 + $0x1a8] sm:$0xff]  ;;  %v85_v52 = vld [vmem:[#allocation5 + $0x120] sm:$0xff] }
  0x1c   :  { %182 = vmatpush.msra.mxu0 %v56_v26  ;;  %220 = vmatpush.msra.mxu2 %v90_v32  ;;  %v67_v47 = vld [vmem:[#allocation5 + $0x90] sm:$0xff]  ;;  %v50_v50 = vld [vmem:[#allocation5 + $0x8] sm:$0xff]  ;;  %v101_v53 = vld [vmem:[#allocation5 + $0x1a0] sm:$0xff] }
  0x1d   :  { %202 = vmatpush.msra.mxu1 %v72_v27  ;;  %240 = vmatpush.msra.mxu3 %v106_v33  ;;  %v66_v51 = vld [vmem:[#allocation5 + $0x88] sm:$0xff]  ;;  %v49_v55 = vld [vmem:[#allocation5] sm:$0xff]  ;;  %v128_v57 = vld [vmem:[#allocation5 + $0x278] sm:$0xff] }
  0x1e   :  { %183 = vmatpush.msra.mxu0 %v55_v30  ;;  %221 = vmatpush.msra.mxu2 %v89_v36  ;;  %v46_v54 = vld [vmem:[#allocation2 + $0x8] sm:$0xff]  ;;  %v65_v56 = vld [vmem:[#allocation5 + $0x80] sm:$0xff]  ;;  %v144_v58 = vld [vmem:[#allocation5 + $0x2f8] sm:$0xff] }
  0x1f   :  { %203 = vmatpush.msra.mxu1 %v71_v31  ;;  %241 = vmatpush.msra.mxu3 %v105_v37  ;;  %153 = vst [vmem:[#allocation1 + $0x10] ss:$2 sm:$0xff] %v46_v54  ;;  %v45_v59 = vld [vmem:[#allocation2] sm:$0xff]  ;;  %v84_v60 = vld [vmem:[#allocation5 + $0x118] sm:$0xff]  ;;  %v127_v62 = vld [vmem:[#allocation5 + $0x270] sm:$0xff] }
  0x20   :  { %184 = vmatpush.msra.mxu0 %v54_v34  ;;  %222 = vmatpush.msra.mxu2 %v88_v40  ;;  %v100_v61 = vld [vmem:[#allocation5 + $0x198] sm:$0xff]  ;;  %151 = vst [vmem:[#allocation1] ss:$2 sm:$0xff] %v45_v59  ;;  %v143_v63 = vld [vmem:[#allocation5 + $0x2f0] sm:$0xff]  ;;  %v126_v3 = vld [vmem:[#allocation5 + $0x268] sm:$0xff] }
  0x21   :  { %204 = vmatpush.msra.mxu1 %v70_v35  ;;  %242 = vmatpush.msra.mxu3 %v104_v41  ;;  %v83_v0 = vld [vmem:[#allocation5 + $0x110] sm:$0xff]  ;;  %v48_v2 = vld [vmem:[#allocation2 + $0x18] sm:$0xf]  ;;  %v142_v4 = vld [vmem:[#allocation5 + $0x2e8] sm:$0xff] }
  0x22   :  { %185 = vmatpush.msra.mxu0 %v53_v38  ;;  %223 = vmatpush.msra.mxu2 %v87_v44  ;;  %v99_v1 = vld [vmem:[#allocation5 + $0x190] sm:$0xff]  ;;  %157 = vst [vmem:[#allocation1 + $0x30] ss:$2 sm:$0xff] %v48_v2  ;;  %v82_v6 = vld [vmem:[#allocation5 + $0x108] sm:$0xff]  ;;  %v125_v8 = vld [vmem:[#allocation5 + $0x260] sm:$0xff] }
  0x23   :  { %205 = vmatpush.msra.mxu1 %v69_v39  ;;  %243 = vmatpush.msra.mxu3 %v103_v45  ;;  %v47_v5 = vld [vmem:[#allocation2 + $0x10] sm:$0xff]  ;;  %v98_v7 = vld [vmem:[#allocation5 + $0x188] sm:$0xff]  ;;  %v141_v9 = vld [vmem:[#allocation5 + $0x2e0] sm:$0xff] }
  0x24   :  { %186 = vmatpush.msra.mxu0 %v52_v42  ;;  %224 = vmatpush.msra.mxu2 %v86_v48  ;;  %155 = vst [vmem:[#allocation1 + $0x20] ss:$2 sm:$0xff] %v47_v5  ;;  %v81_v10 = vld [vmem:[#allocation5 + $0x100] sm:$0xff]  ;;  %v124_v12 = vld [vmem:[#allocation5 + $0x258] sm:$0xff]  ;;  %v123_v16 = vld [vmem:[#allocation5 + $0x250] sm:$0xff] }
  0x25   :  { %206 = vmatpush.msra.mxu1 %v68_v43  ;;  %244 = vmatpush.msra.mxu3 %v102_v49  ;;  %v97_v11 = vld [vmem:[#allocation5 + $0x180] sm:$0xff]  ;;  %v140_v13 = vld [vmem:[#allocation5 + $0x2d8] sm:$0xff]  ;;  %v139_v17 = vld [vmem:[#allocation5 + $0x2d0] sm:$0xff] }
  0x26   :  { %187 = vmatpush.msra.mxu0 %v51_v46  ;;  %225 = vmatpush.msra.mxu2 %v85_v52  ;;  %v160_v14 = vld.sshfl [vmem:[#allocation1 + $0x10] sm:$0xff pattern:$0x75316420]  ;;  %v161_v15 = vld.sshfl [vmem:[#allocation1 + $0x18] sm:$0xff pattern:$0x75316420] }
  0x27   :  { %207 = vmatpush.msra.mxu1 %v67_v47  ;;  %245 = vmatpush.msra.mxu3 %v101_v53  ;;  %v146_v18 = vld [vmem:[#allocation5 + $0x308] sm:$0xff]  ;;  %v158_v19 = vld.sshfl [vmem:[#allocation1] sm:$0xff pattern:$0x75316420]  ;;  %v119_v29 = vld [vmem:[#allocation5 + $0x230] sm:$0xff] }
  0x28   :  { %188 = vmatpush.msra.mxu0 %v50_v50  ;;  %226 = vmatpush.msra.mxu2 %v84_v60  ;;  %v122_v20 = vld [vmem:[#allocation5 + $0x248] sm:$0xff]  ;;  %v145_v23 = vld [vmem:[#allocation5 + $0x300] sm:$0xff]  ;;  %v120_v26 = vld [vmem:[#allocation5 + $0x238] sm:$0xff] }
  0x29   :  { %208 = vmatpush.msra.mxu1 %v66_v51  ;;  %246 = vmatpush.msra.mxu3 %v100_v61  ;;  %v138_v21 = vld [vmem:[#allocation5 + $0x2c8] sm:$0xff]  ;;  %v121_v24 = vld [vmem:[#allocation5 + $0x240] sm:$0xff]  ;;  %v136_v27 = vld [vmem:[#allocation5 + $0x2b8] sm:$0xff] }
  0x2a   :  { %189 = vmatpush.msra.mxu0 %v49_v55  ;;  %227 = vmatpush.msra.mxu2 %v83_v0  ;;  %v159_v22 = vld.sshfl [vmem:[#allocation1 + $0x8] sm:$0xff pattern:$0x75316420]  ;;  %v164_v28 = vld.sshfl [vmem:[#allocation1 + $0x30] sm:$0xff pattern:$0x75316420] }
  0x2b   :  { %209 = vmatpush.msra.mxu1 %v65_v56  ;;  %247 = vmatpush.msra.mxu3 %v99_v1  ;;  %v137_v25 = vld [vmem:[#allocation5 + $0x2c0] sm:$0xff]  ;;  %v135_v30 = vld [vmem:[#allocation5 + $0x2b0] sm:$0xff]  ;;  %v118_v31 = vld [vmem:[#allocation5 + $0x228] sm:$0xff] }
  0x2c   :  { %254 = vmatpush.msrb.mxu0 %v128_v57  ;;  %228 = vmatpush.msra.mxu2 %v82_v6  ;;  %v134_v32 = vld [vmem:[#allocation5 + $0x2a8] sm:$0xff]  ;;  %v117_v33 = vld [vmem:[#allocation5 + $0x220] sm:$0xff]  ;;  %v116_v35 = vld [vmem:[#allocation5 + $0x218] sm:$0xff] }
  0x2d   :  { %274 = vmatpush.msrb.mxu1 %v144_v58  ;;  %248 = vmatpush.msra.mxu3 %v98_v7  ;;  %v133_v34 = vld [vmem:[#allocation5 + $0x2a0] sm:$0xff]  ;;  %v132_v36 = vld [vmem:[#allocation5 + $0x298] sm:$0xff]  ;;  %v115_v37 = vld [vmem:[#allocation5 + $0x210] sm:$0xff] }
  0x2e   :  { %255 = vmatpush.msrb.mxu0 %v127_v62  ;;  %229 = vmatpush.msra.mxu2 %v81_v10  ;;  %v131_v38 = vld [vmem:[#allocation5 + $0x290] sm:$0xff]  ;;  %v114_v39 = vld [vmem:[#allocation5 + $0x208] sm:$0xff]  ;;  %v113_v41 = vld [vmem:[#allocation5 + $0x200] sm:$0xff] }
  0x2f   :  { %275 = vmatpush.msrb.mxu1 %v143_v63  ;;  %249 = vmatpush.msra.mxu3 %v97_v11  ;;  %v130_v40 = vld [vmem:[#allocation5 + $0x288] sm:$0xff]  ;;  %v129_v42 = vld [vmem:[#allocation5 + $0x280] sm:$0xff]  ;;  %v345_v57 = vld [vmem:[%s463_s2] ss:$0 sm:$0xff] }
  0x30   :  { %256 = vmatpush.msrb.mxu0 %v126_v3  ;;  %230 = vmatmul.f32.vlgmr.msra.gmra.mxu2 %v160_v14  ;;  %v162_v43 = vld.sshfl [vmem:[#allocation1 + $0x20] sm:$0xff pattern:$0x75316420]  ;;  %v163_v44 = vld.sshfl [vmem:[#allocation1 + $0x28] sm:$0xff pattern:$0x75316420] }
  0x31   :  { %276 = vmatpush.msrb.mxu1 %v142_v4  ;;  %250 = vmatmul.f32.vlgmr.msra.gmra.mxu3 %v161_v15 }
  0x32   :  { %257 = vmatpush.msrb.mxu0 %v125_v8  ;;  %308 = vmatpush.msrb.mxu2 %v146_v18 }
  0x33   :  { %277 = vmatpush.msrb.mxu1 %v141_v9  ;;  %190 = vmatmul.f32.vlgmr.msra.gmra.mxu0 %v158_v19 }
  0x34   :  { %258 = vmatpush.msrb.mxu0 %v124_v12  ;;  %210 = vmatmul.f32.vlgmr.msra.gmra.mxu1 %v159_v22 }
  0x35   :  { %278 = vmatpush.msrb.mxu1 %v140_v13  ;;  %309 = vmatpush.msrb.mxu2 %v145_v23 }
  0x36   :  { %259 = vmatpush.msrb.mxu0 %v123_v16 }
  0x37   :  { %279 = vmatpush.msrb.mxu1 %v139_v17 }
  0x38   :  { %260 = vmatpush.msrb.mxu0 %v122_v20  ;;  %339 = vmatmul.msk.f32.vlgmr.msrb.gmra.mxu2 %vm171_vm0, %v164_v28 }
  0x39   :  { %280 = vmatpush.msrb.mxu1 %v138_v21 }
  0x3a   :  { %261 = vmatpush.msrb.mxu0 %v121_v24 }
  0x3b   :  { %281 = vmatpush.msrb.mxu1 %v137_v25 }
  0x3c   :  { %262 = vmatpush.msrb.mxu0 %v120_v26 }
  0x3d   :  { %282 = vmatpush.msrb.mxu1 %v136_v27 }
  0x3e   :  { %263 = vmatpush.msrb.mxu0 %v119_v29 }
  0x3f   :  { %283 = vmatpush.msrb.mxu1 %v135_v30 }
  0x40   :  { %264 = vmatpush.msrb.mxu0 %v118_v31 }
  0x41   :  { %284 = vmatpush.msrb.mxu1 %v134_v32 }
  0x42   :  { %265 = vmatpush.msrb.mxu0 %v117_v33 }
  0x43   :  { %285 = vmatpush.msrb.mxu1 %v133_v34 }
  0x44   :  { %266 = vmatpush.msrb.mxu0 %v116_v35 }
  0x45   :  { %286 = vmatpush.msrb.mxu1 %v132_v36 }
  0x46   :  { %267 = vmatpush.msrb.mxu0 %v115_v37 }
  0x47   :  { %287 = vmatpush.msrb.mxu1 %v131_v38 }
  0x48   :  { %268 = vmatpush.msrb.mxu0 %v114_v39 }
  0x49   :  { %288 = vmatpush.msrb.mxu1 %v130_v40 }
  0x4a   :  { %269 = vmatpush.msrb.mxu0 %v113_v41 }
  0x4b   :  { %289 = vmatpush.msrb.mxu1 %v129_v42  ;;  %270 = vmatmul.f32.vlgmr.msrb.gmra.mxu0 %v162_v43 }
  0x4c   :  { %290 = vmatmul.f32.vlgmr.msrb.gmra.mxu1 %v163_v44 }
  0xb0   :  { %v191_v45 = vpop.f32.mrf.mxu0 }
  0xb1   :  { %v211_v46 = vpop.f32.mrf.mxu1 }
  0xb2   :  { %v212_v47 = vadd.f32 %v211_v46, %v191_v45 }
  0xb3   :  { %v231_v48 = vpop.f32.mrf.mxu2 }
  0xb4   :  { %v232_v49 = vadd.f32 %v231_v48, %v212_v47  ;;  %v251_v50 = vpop.f32.mrf.mxu3 }
  0xb6   :  { %v252_v51 = vadd.f32 %v251_v50, %v232_v49 }
  0xbb   :  { %v311_v55 = vpop.f32.mrf.mxu2 }
  0xc8   :  { %v271_v52 = vpop.f32.mrf.mxu0 }
  0xc9   :  { %v291_v53 = vpop.f32.mrf.mxu1  ;;  %v272_v54 = vadd.f32 %v271_v52, %v252_v51 }
  0xcb   :  { %v292_v56 = vadd.f32 %v291_v53, %v272_v54 }
  0xcd   :  { %v312_v58 = vadd.f32 %v311_v55, %v292_v56 }
  0xcf   :  { %v318_v59 = vadd.f32 %v345_v57, %v312_v58 }
  0xd1   :  { %320 = vst.msk [vmem:[#allocation7] sm:$0xf] %vm319_vm1, %v318_v59 }
  0xd2   :  { %331 = dma.vmem_to_hbm [thread:$0]  %s327_s25, 64, %s329_s28, [#allocation4]  }
  0xd3   :  { %422 = dma.done.wait [#allocation4], 64  }
  0xd4   :  { %423 = vsyncadd [#allocation4], 4294967232 }
  0xd5   :  { %336 = vsyncpa [#allocation3], 1 }
  0xd6   :  { %337 = vsyncpa [#allocation6], 1 }
  0xd7   :  { %338 = vsyncpa [#allocation4], 1 }

</bundles_post_ra>
